<compile_context>
chip_gen: v5e
topology: v5e:2x2
jax: 0.10.0
libtpu: 0.0.40
codegen_flags: <defaults>
</compile_context>

<pallas_src>
import math

import numpy as np
import jax
import jax.numpy as jnp
from jax.experimental import pallas as pl
from jax.experimental.pallas import tpu as pltpu

_INV_SQRT2 = 0.7071067811865476
_BN_EPS = 1e-5

# Budget (bytes) for the double-buffered x tile pair in stage 1 (lane-dense, so the
# logical bytes equal the real VMEM footprint).
_X_PAIR_BYTES = 16 * 1024 * 1024
# Cap on the number of 128-lane groups reduced per grid step (bounds unrolled code).
_MAX_GROUPS = 128
# Explicit scoped-VMEM limit: > v5e default (16 MiB), < v7x physical (64 MiB).
_VMEM_LIMIT_BYTES = 48 * 1024 * 1024


def _lcm(a, b):
    return a * b // math.gcd(a, b)


def _make_stage1_kernel(M, tc, LW, nc_per, nc_total, tb):
    """Streaming, lane-dense partial-sum kernel over the flattened (node*feature) axis."""
    K = tc // LW
    ragged = (M % tc) != 0
    if ragged:
        last = nc_total - 1
        s_last = last // nc_per
        n_last = last % nc_per
        last_valid = M - last * tc          # > 0, Python int (static)

    def accumulate(x_ref, acc, limit):
        # `limit` is a Python int, so all masking is resolved at trace time: full
        # slices get a plain load+add, the single straddling slice gets a static
        # iota mask, fully-invalid slices are skipped.
        for k in range(K):
            lo = k * LW
            if lo >= limit:
                break
            v = x_ref[:, lo:lo + LW].astype(jnp.float32)
            if lo + LW > limit:
                lane = jax.lax.broadcasted_iota(jnp.int32, (tb, LW), 1)
                v = jnp.where(lane < (limit - lo), v, 0.0)
            acc = acc + v
        return acc

    def kernel(x_ref, psum_ref):
        s = pl.program_id(0)
        n = pl.program_id(2)

        @pl.when(n == 0)
        def _():
            psum_ref[...] = jnp.zeros_like(psum_ref)

        if not ragged:
            psum_ref[...] = accumulate(x_ref, psum_ref[...], tc)
        else:
            is_last = jnp.logical_and(s == s_last, n == n_last)

            @pl.when(jnp.logical_not(is_last))
            def _():
                psum_ref[...] = accumulate(x_ref, psum_ref[...], tc)

            @pl.when(is_last)
            def _():
                psum_ref[...] = accumulate(x_ref, psum_ref[...], last_valid)

    return kernel


def _make_stage2_kernel(S, LW, D, inv_n):
    """Epilogue: fold partial sums, gap-scale, embed(+BN)+GELU, attend+sigmoid, gate."""
    groups = LW // D

    def kernel(psum_ref, w_e_ref, b_e_ref, w_a_ref, b_a_ref, out_ref, att_ref):
        # Fold the per-TensorCore split partial sums (S <= 2).
        p = psum_ref[0, :, :]
        for s_i in range(1, S):
            p = p + psum_ref[s_i, :, :]
        # Fold the LW lane groups back onto the true feature dimension D.
        xs = p[:, 0:D]
        for g in range(1, groups):
            xs = xs + p[:, g * D:(g + 1) * D]
        x_readout = xs * inv_n                                                  # gap()
        # embed: Linear + folded eval-mode BatchNorm, exact erf-GELU
        e = jnp.dot(x_readout, w_e_ref[...],
                    preferred_element_type=jnp.float32) + b_e_ref[...]
        e = 0.5 * e * (1.0 + jax.lax.erf(e * _INV_SQRT2))
        # attend + sigmoid -> per-graph per-feature gate (Dropout = eval identity)
        att = jax.nn.sigmoid(jnp.dot(e, w_a_ref[...],
                                     preferred_element_type=jnp.float32) + b_a_ref[...])
        att_ref[...] = att
        # (x * att[:, None, :]).mean(1) == mean(x, 1) * att  (att has no node dep)
        out_ref[...] = x_readout * att

    return kernel


def module_sero_forward(x, params, batch=None, *, tile_cols=None, tile_b=128):
    """Eval-mode ModuleSERO forward. Returns (pooled (B, D), attention (B, Dout))."""
    # `batch` (node -> graph assignment) is unused for dense equal-sized graphs.
    # TODO(synk): ragged graphs would need scalar-prefetch node offsets/counts for gap().
    del batch
    B, N, D = x.shape
    H = params["w_embed"].shape[1]
    Dout = params["w_attend"].shape[1]
    assert Dout == D, "broadcast in the reference forward requires output_dim == feature dim"

    # Fold eval-mode BatchNorm (+ linear bias) into the embed weights at trace time.
    scale = params["gamma"] * jax.lax.rsqrt(params["running_var"] + _BN_EPS)   # (1, H)
    w_e = (params["w_embed"] * scale).astype(jnp.float32)                      # (D, H)
    b_e = ((params["b_embed"] - params["running_mean"]) * scale
           + params["beta"]).astype(jnp.float32)                               # (1, H)
    w_a = params["w_attend"].astype(jnp.float32)                               # (H, Dout)
    b_a = params["b_attend"].astype(jnp.float32)                               # (1, Dout)

    M = N * D                          # flattened (node, feature) axis
    LW = _lcm(D, 128)                  # lane-dense accumulator width
    itemsize = jnp.dtype(x.dtype).itemsize

    # ---- B tiling ------------------------------------------------------------------
    if B <= tile_b:
        tb, Bt = B, 1                  # full-B block (satisfies the tiling rule)
    else:
        tb = max(8, (tile_b // 8) * 8)
        Bt = pl.cdiv(B, tb)            # last B block may be ragged (garbage rows dropped)
    B_pad = Bt * tb

    # ---- column (node*feature) tiling, lane-dense ------------------------------------
    m_ceil = pl.cdiv(M, LW) * LW
    if tile_cols is None:
        cap_vmem = max(LW, (_X_PAIR_BYTES // (2 * tb * itemsize)) // LW * LW)
        tc = min(m_ceil, cap_vmem, _MAX_GROUPS * LW)
    else:
        tc = min(m_ceil, max(LW, (tile_cols // LW) * LW))
    nc_total = pl.cdiv(M, tc)

    # ---- split the reduction across TensorCores when there is only one B tile (v7x) --
    S = 2 if (Bt == 1 and nc_total >= 2 and nc_total % 2 == 0) else 1
    nc_per = nc_total // S

    xf = x.reshape(B, M)               # contiguous dim merge: free under jit, no HBM copy

    # Stage 1: stream x once, lane-dense, accumulating raw partial sums per (split, B tile).
    psum = pl.pallas_call(
        _make_stage1_kernel(M, tc, LW, nc_per, nc_total, tb),
        out_shape=jax.ShapeDtypeStruct((S, B_pad, LW), jnp.float32),
        grid_spec=pltpu.PrefetchScalarGridSpec(
            num_scalar_prefetch=0,
            grid=(S, Bt, nc_per),
            in_specs=[pl.BlockSpec((tb, tc), lambda s, b, n: (b, s * nc_per + n))],
            out_specs=pl.BlockSpec((None, tb, LW), lambda s, b, n: (s, b, 0)),
        ),
        compiler_params=pltpu.CompilerParams(
            dimension_semantics=("parallel", "parallel", "arbitrary"),
            vmem_limit_bytes=_VMEM_LIMIT_BYTES),
    )(xf)

    # Stage 2: tiny one-block-per-B-tile epilogue (fold + matmuls + GELU + sigmoid + gate).
    out, att = pl.pallas_call(
        _make_stage2_kernel(S, LW, D, np.float32(1.0 / N)),
        out_shape=(jax.ShapeDtypeStruct((B_pad, D), jnp.float32),
                   jax.ShapeDtypeStruct((B_pad, Dout), jnp.float32)),
        grid_spec=pltpu.PrefetchScalarGridSpec(
            num_scalar_prefetch=0,
            grid=(Bt,),
            in_specs=[
                pl.BlockSpec((S, tb, LW), lambda j: (0, j, 0)),
                pl.BlockSpec((D, H), lambda j: (0, 0)),           # resident weights
                pl.BlockSpec((1, H), lambda j: (0, 0)),
                pl.BlockSpec((H, Dout), lambda j: (0, 0)),
                pl.BlockSpec((1, Dout), lambda j: (0, 0)),
            ],
            out_specs=(
                pl.BlockSpec((tb, D), lambda j: (j, 0)),
                pl.BlockSpec((tb, Dout), lambda j: (j, 0)),
            ),
        ),
        compiler_params=pltpu.CompilerParams(dimension_semantics=("parallel",)),
    )(psum, w_e, b_e, w_a, b_a)

    if B_pad != B:
        out = out[:B]
        att = att[:B]
    return out, att


def module_sero_reference(x, params):
    """Pure-JAX reference of the same (eval-mode) forward, for validation."""
    xr = jnp.mean(x, axis=1)
    e = xr @ params["w_embed"] + params["b_embed"][0]
    e = (e - params["running_mean"][0]) / jnp.sqrt(params["running_var"][0] + _BN_EPS)
    e = e * params["gamma"][0] + params["beta"][0]
    e = 0.5 * e * (1.0 + jax.lax.erf(e * _INV_SQRT2))
    att = jax.nn.sigmoid(e @ params["w_attend"] + params["b_attend"][0])
    out = jnp.mean(x * att[:, None, :], axis=1)
    return out, att


def init_params(key, hidden_dim, output_dim, upscale=1.0):
    """Deterministic synthetic parameters (shapes follow ModuleSERO.__init__)."""
    H = round(upscale * hidden_dim)
    k = jax.random.split(key, 8)
    bound_e = 1.0 / math.sqrt(hidden_dim)
    bound_a = 1.0 / math.sqrt(H)
    return {
        # nn.Linear(hidden_dim, H): stored as (in, out) for x @ W
        "w_embed": jax.random.uniform(k[0], (hidden_dim, H), jnp.float32,
                                      -bound_e, bound_e),
        "b_embed": jax.random.uniform(k[1], (1, H), jnp.float32, -bound_e, bound_e),
        # nn.BatchNorm1d(H) - eval-mode affine + running stats
        "gamma": 1.0 + 0.1 * jax.random.normal(k[2], (1, H), jnp.float32),
        "beta": 0.1 * jax.random.normal(k[3], (1, H), jnp.float32),
        "running_mean": 0.1 * jax.random.normal(k[4], (1, H), jnp.float32),
        "running_var": 1.0 + 0.1 * jax.random.uniform(k[5], (1, H), jnp.float32),
        # nn.Linear(H, output_dim)
        "w_attend": jax.random.uniform(k[6], (H, output_dim), jnp.float32,
                                       -bound_a, bound_a),
        "b_attend": jax.random.uniform(k[7], (1, output_dim), jnp.float32,
                                       -bound_a, bound_a),
    }


if __name__ == "__main__":
    B, N, D = 2, 50, 32         # graphs, nodes per graph, feature dim
    hidden_dim = D
    output_dim = D              # forced by the broadcast in the reference forward

    key = jax.random.PRNGKey(0)
    kx, kx2, kp = jax.random.split(key, 3)
    x = jax.random.normal(kx, (B, N, D), dtype=jnp.float32)
    params = init_params(kp, hidden_dim, output_dim, upscale=1.0)
    ref_out, ref_att = module_sero_reference(x, params)

    def check(got, want, rtol=1e-5, atol=1e-5):
        np.testing.assert_allclose(np.asarray(got), np.asarray(want),
                                   rtol=rtol, atol=atol)

    # Path 1: tile_cols=512 -> 4 column chunks (even) -> 2-way TensorCore reduction
    # split (S=2), ragged last chunk masked in-kernel.
    out, att = jax.block_until_ready(module_sero_forward(x, params, tile_cols=512))
    check(out, ref_out); check(att, ref_att)
    assert out.shape == (B, D) and att.shape == (B, output_dim)

    # Path 2: auto tile sizing -> single lane-dense chunk per graph row (S=1).
    out2, att2 = jax.block_until_ready(module_sero_forward(x, params))
    check(out2, ref_out); check(att2, ref_att)

    # Path 3: odd chunk count -> no core split, multi-step streaming + ragged tail.
    out3, att3 = jax.block_until_ready(module_sero_forward(x, params, tile_cols=384))
    check(out3, ref_out); check(att3, ref_att)

    # Path 4: bf16 activations stay bf16 in HBM (cast to f32 only inside the kernel).
    xb = x.astype(jnp.bfloat16)
    ref_out_b, ref_att_b = module_sero_reference(xb.astype(jnp.float32), params)
    out4, att4 = jax.block_until_ready(module_sero_forward(xb, params, tile_cols=512))
    check(out4, ref_out_b, rtol=1e-4, atol=1e-4)
    check(att4, ref_att_b, rtol=1e-4, atol=1e-4)

    # Path 5: B > tile_b -> multiple B tiles (tb=8), padded/garbage rows dropped.
    B2 = 20
    x2 = jax.random.normal(kx2, (B2, N, D), dtype=jnp.float32)
    ref_out2, ref_att2 = module_sero_reference(x2, params)
    out5, att5 = jax.block_until_ready(
        module_sero_forward(x2, params, tile_cols=512, tile_b=8))
    check(out5, ref_out2); check(att5, ref_att2)
    assert out5.shape == (B2, D) and att5.shape == (B2, output_dim)

    print("KERNEL_OK")
</pallas_src>

<mosaic_0001>
module attributes {stable_mosaic.version = 11 : i64} {
  func.func @kernel(%arg0: i32, %arg1: i32, %arg2: i32, %arg3: memref<2x512xf32, #tpu.memory_space<vmem>>, %arg4: memref<1x2x128xf32, #tpu.memory_space<vmem>>) attributes {dimension_semantics = [#tpu.dimension_semantics<parallel>, #tpu.dimension_semantics<parallel>, #tpu.dimension_semantics<arbitrary>], iteration_bounds = array<i64: 2, 1, 2>, scalar_prefetch = 0 : i64, scratch_operands = 0 : i64, tpu.core_type = #tpu.core_type<tc>, window_params = [{transform_indices = @transform_0, window_bounds = array<i64: 2, 512>}, {transform_indices = @transform_1, window_bounds = array<i64: 1, 2, 128>}]} {
    %c0_i32 = arith.constant 0 : i32
    %0 = arith.cmpi eq, %arg2, %c0_i32 : i32
    %1 = arith.extui %0 : i1 to i32
    %c0_i32_0 = arith.constant 0 : i32
    %2 = arith.cmpi ne, %1, %c0_i32_0 : i32
    scf.if %2 {
      %cst = arith.constant 0.000000e+00 : f32
      %11 = vector.broadcast %cst : f32 to vector<2x128xf32>
      %c0 = arith.constant 0 : index
      %c0_4 = arith.constant 0 : index
      %c0_5 = arith.constant 0 : index
      %12 = vector.load %arg4[%c0, %c0_4, %c0_5] : memref<1x2x128xf32, #tpu.memory_space<vmem>>, vector<1x2x128xf32>
      %13 = vector.shape_cast %12 : vector<1x2x128xf32> to vector<2x128xf32>
      %14 = vector.shape_cast %11 : vector<2x128xf32> to vector<1x2x128xf32>
      tpu.vector_store %arg4[%c0, %c0_4, %c0_5], %14 {strides = array<i32>} : memref<1x2x128xf32, #tpu.memory_space<vmem>>, vector<1x2x128xf32>,
    } else {
    }
    %c1_i32 = arith.constant 1 : i32
    %3 = arith.cmpi eq, %arg0, %c1_i32 : i32
    %c1_i32_1 = arith.constant 1 : i32
    %4 = arith.cmpi eq, %arg2, %c1_i32_1 : i32
    %5 = arith.andi %3, %4 : i1
    %true = arith.constant true
    %6 = arith.xori %5, %true : i1
    %7 = arith.extui %6 : i1 to i32
    %c0_i32_2 = arith.constant 0 : i32
    %8 = arith.cmpi ne, %7, %c0_i32_2 : i32
    scf.if %8 {
      %c0 = arith.constant 0 : index
      %c0_4 = arith.constant 0 : index
      %c0_5 = arith.constant 0 : index
      %11 = vector.load %arg4[%c0, %c0_4, %c0_5] : memref<1x2x128xf32, #tpu.memory_space<vmem>>, vector<1x2x128xf32>
      %12 = vector.shape_cast %11 : vector<1x2x128xf32> to vector<2x128xf32>
      %c0_6 = arith.constant 0 : index
      %c0_7 = arith.constant 0 : index
      %13 = vector.load %arg3[%c0_6, %c0_7] : memref<2x512xf32, #tpu.memory_space<vmem>>, vector<2x128xf32>
      %14 = arith.addf %12, %13 : vector<2x128xf32>
      %c0_8 = arith.constant 0 : index
      %c128 = arith.constant 128 : index
      %15 = vector.load %arg3[%c0_8, %c128] : memref<2x512xf32, #tpu.memory_space<vmem>>, vector<2x128xf32>
      %16 = arith.addf %14, %15 : vector<2x128xf32>
      %c0_9 = arith.constant 0 : index
      %c256 = arith.constant 256 : index
      %17 = vector.load %arg3[%c0_9, %c256] : memref<2x512xf32, #tpu.memory_space<vmem>>, vector<2x128xf32>
      %18 = arith.addf %16, %17 : vector<2x128xf32>
      %c0_10 = arith.constant 0 : index
      %c384 = arith.constant 384 : index
      %19 = vector.load %arg3[%c0_10, %c384] : memref<2x512xf32, #tpu.memory_space<vmem>>, vector<2x128xf32>
      %20 = arith.addf %18, %19 : vector<2x128xf32>
      %c0_11 = arith.constant 0 : index
      %c0_12 = arith.constant 0 : index
      %c0_13 = arith.constant 0 : index
      %21 = vector.load %arg4[%c0_11, %c0_12, %c0_13] : memref<1x2x128xf32, #tpu.memory_space<vmem>>, vector<1x2x128xf32>
      %22 = vector.shape_cast %21 : vector<1x2x128xf32> to vector<2x128xf32>
      %23 = vector.shape_cast %20 : vector<2x128xf32> to vector<1x2x128xf32>
      tpu.vector_store %arg4[%c0_11, %c0_12, %c0_13], %23 {strides = array<i32>} : memref<1x2x128xf32, #tpu.memory_space<vmem>>, vector<1x2x128xf32>,
    } else {
    }
    %9 = arith.extui %5 : i1 to i32
    %c0_i32_3 = arith.constant 0 : i32
    %10 = arith.cmpi ne, %9, %c0_i32_3 : i32
    scf.if %10 {
      %c0 = arith.constant 0 : index
      %c0_4 = arith.constant 0 : index
      %c0_5 = arith.constant 0 : index
      %11 = vector.load %arg4[%c0, %c0_4, %c0_5] : memref<1x2x128xf32, #tpu.memory_space<vmem>>, vector<1x2x128xf32>
      %12 = vector.shape_cast %11 : vector<1x2x128xf32> to vector<2x128xf32>
      %c0_6 = arith.constant 0 : index
      %c0_7 = arith.constant 0 : index
      %13 = vector.load %arg3[%c0_6, %c0_7] : memref<2x512xf32, #tpu.memory_space<vmem>>, vector<2x128xf32>
      %14 = tpu.iota {dimensions = array<i32: 1>} : vector<2x128xi32>
      %c64_i32 = arith.constant 64 : i32
      %15 = vector.broadcast %c64_i32 : i32 to vector<2x128xi32>
      %16 = arith.cmpi slt, %14, %15 : vector<2x128xi32>
      %cst = arith.constant 0.000000e+00 : f32
      %17 = vector.broadcast %cst : f32 to vector<2x128xf32>
      %18 = arith.select %16, %13, %17 : vector<2x128xi1>, vector<2x128xf32>
      %19 = arith.addf %12, %18 : vector<2x128xf32>
      %c0_8 = arith.constant 0 : index
      %c0_9 = arith.constant 0 : index
      %c0_10 = arith.constant 0 : index
      %20 = vector.load %arg4[%c0_8, %c0_9, %c0_10] : memref<1x2x128xf32, #tpu.memory_space<vmem>>, vector<1x2x128xf32>
      %21 = vector.shape_cast %20 : vector<1x2x128xf32> to vector<2x128xf32>
      %22 = vector.shape_cast %19 : vector<2x128xf32> to vector<1x2x128xf32>
      tpu.vector_store %arg4[%c0_8, %c0_9, %c0_10], %22 {strides = array<i32>} : memref<1x2x128xf32, #tpu.memory_space<vmem>>, vector<1x2x128xf32>,
    } else {
    }
    return
  }
  func.func @transform_0(%arg0: i32, %arg1: i32, %arg2: i32) -> (i32, i32) {
    %c2_i32 = arith.constant 2 : i32
    %0 = arith.muli %arg0, %c2_i32 : i32
    %1 = arith.addi %0, %arg2 : i32
    %c0_i32 = arith.constant 0 : i32
    return %arg1, %1 : i32, i32
  }
  func.func @transform_1(%arg0: i32, %arg1: i32, %arg2: i32) -> (i32, i32, i32) {
    %c0_i32 = arith.constant 0 : i32
    %c0_i32_0 = arith.constant 0 : i32
    return %arg0, %arg1, %c0_i32 : i32, i32, i32
  }
}

</mosaic_0001>

<bundles_post_ra>
// kernel: tpu_custom_call.1
= control target key start
LH: loop header
LB: loop body
LE: loop exit
PB: predicated region body
PF: predicated region fallthrough
CT: control target
= control target key end

     0   :  { %6 = vsyncpa [#allocation3], 0  ;;  %s834_s0 = inlined_call_operand.hbm [shape: f32[2,1600], index: 0, kind: input, shape index: {}]   ;;  %s835_s1 = inlined_call_operand.hbm [shape: f32[2,2,128], index: 1, kind: output, shape index: {}]  }
   0x1   :  { %8 = vsyncpa [#allocation3 + $0x1], 0 }
   0x2   :  { %9 = vsyncpa [#allocation4], 0 }
   0x3   :  { %11 = vsyncpa [#allocation4 + $0x1], 0  ;;  %s614_s6 = smov 0   ;;  %s616_s7 = smov 0  }
   0x4   :  { %s618_s8 = smov 0   ;;  %s620_s9 = smov 0  }
   0x5   :  { %s622_s10 = smov 0   ;;  %s624_s11 = smov 0  }
   0x6   :  { %s626_s12 = smov 0   ;;  %s628_s13 = smov 0  }
   0x7   :  { %s630_s14 = smov 0   ;;  %s632_s15 = smov 0  }
   0x8   :  { %s634_s16 = smov 0  }
   0x9 LB: > { %840 = sst [smem:[#allocation8_spill]] %s592_s14  ;;  %s319_s17 = sadd.s32 4294967295, %s600_s16   ;;  %s600_s16 = sphi %s634_s16, %s17_s16   ;;  %s596_s15 = sphi %s632_s15, %s854_s15   ;;  %s592_s14 = sphi %s630_s14, %s853_s14   ;;  %s588_s13 = sphi %s628_s13, %s852_s13   ;;  %s584_s12 = sphi %s626_s12, %s851_s12   ;;  %s580_s11 = sphi %s624_s11, %s860_s11   ;;  %s576_s10 = sphi %s622_s10, %s859_s10   ;;  %s572_s9 = sphi %s620_s9, %s858_s9   ;;  %s568_s8 = sphi %s618_s8, %s857_s8   ;;  %s564_s7 = sphi %s616_s7, %s856_s7   ;;  %s560_s6 = sphi %s614_s6, %s855_s6  }
   0xa   : > { %841 = sst [smem:[#allocation9_spill]] %s596_s15  ;;  %s320_s18 = sadd.s32 4294967294, %s600_s16  }
   0xb   : > { %s29_s19 = sadd.s32 1, %s592_s14  ;;  %s36_s20 = sadd.s32 1, %s596_s15 }
   0xc   : > { %p30_p0 = scmp.ge.s32.totalorder %s29_s19, 2  ;;  %s321_s21 = sshll.u32 %s596_s15, 1 }
   0xd   : > { %s673_s22 = sadd.s32 %s592_s14, %s321_s21  ;;  %s49_s23 = sadd.s32 1, %s580_s11 }
   0xe   : > { %s862_s19 = smov (%p30_p0, %s29_s19), 0  ;;  %s864_s20 = smov (!%p30_p0, %s36_s20), %s596_s15 }
   0xf   : > { %842 = sst [smem:[#allocation10_spill]] %s862_s19  ;;  %p56_p1 = scmp.ne.s32.totalorder %s580_s11, %s576_s10 }
  0x10   : > { %p57_p2 = scmp.eq.s32.totalorder %s600_s16, 0  ;;  %p38_p3 = scmp.ge.s32.totalorder %s864_s20, 2 }
  0x11   : > { %p62_p4 = scmp.ne.s32.totalorder %s576_s10, %s572_s9  ;;  %p63_p6 = scmp.eq.s32.totalorder %s319_s17, 0 }
  0x12   : > { %p683_p5 = por %p57_p2, %p56_p1  ;;  %s866_s20 = smov (%p38_p3, %s864_s20), 0 }
  0x13   : > { %844 = sst [smem:[#allocation11_spill]] %s866_s20  ;;  %p689_p7 = por %p63_p6, %p62_p4 }
  0x14   : > { %s77_s26 = sadd.s32 1, %s568_s8  ;;  %s322_s27 = sshll.u32 %s866_s20, 1 }
  0x15   : > { %s72_s28 = ssub.s32 %s596_s15, %s866_s20  ;;  %s43_s29 = sadd.s32 %s322_s27, %s862_s19 }
  0x16   : > { %p75_p8 = scmp.eq.s32.totalorder %s72_s28, 0  ;;  %s45_s30 = ssub.s32 %s673_s22, %s43_s29 }
  0x17   : > { %p87_p9 = scmp.ne.s32.totalorder %s568_s8, %s564_s7  ;;  %p47_p10 = scmp.eq.s32.totalorder %s45_s30, 0 }
  0x18   : > { %p88_p11 = scmp.eq.s32.totalorder %s319_s17, 3  ;;  %p93_p13 = scmp.ne.s32.totalorder %s564_s7, %s560_s6 }
  0x19   : > { %s702_s2 = scalar_select %p75_p8, %s568_s8, %s77_s26  }
  0x1a   : > { %s705_s3 = scalar_select %p47_p10, %s580_s11, %s49_s23  }
  0x1b   : > { %p707_p12 = por %p88_p11, %p87_p9  ;;  %p94_p0 = scmp.eq.s32.totalorder %s320_s18, 3 }
  0x1c   : > { %846 = sst [smem:[#allocation12_spill]] %s705_s3  ;;  %p324_p2 = scmp.ge.s32.totalorder %s600_s16, 4 }
  0x1d   : > { %p715_p1 = por %p94_p0, %p93_p13 }
  0x1e   : > { %110 = sbr.rel (%p324_p2) target bundleno = 70 (0x46), region = 16 }
  0x23   : > { %113 = sbr.rel (!%p683_p5) target bundleno = 70 (0x46), region = 20  ;;  %s114_s9 = sand.u32 (%p683_p5), 1, %s580_s11  }
  0x24   : > { %s327_s17 = sshll.u32 (%p683_p5), %s673_s22, 2  ;;  %s325_s21 = sshll.u32 (%p683_p5), %s114_s9, 3 }
  0x25   : > { %s122_s23 = ssub.s32 (%p683_p5), 13, %s327_s17  ;;  %s727_s28 = scalar_lea.sflag (%p683_p5), [#allocation3], %s114_s9 }
  0x26   : > { %p123_p3 = scmp.lt.s32.totalorder (%p683_p5), %s122_s23, 4  ;;  %s118_s29 = scalar_lea.vmem (%p683_p5), [#allocation2], %s325_s21 }
  0x28   : > { %s868_s23 = smov (!%p123_p3, %s122_s23), 4 }
  0x29   : > { %s328_s18 = sshll.u32 %s868_s23, 1 }
  0x2a   : > { %s126_s26 = ssub.s32 8, %s328_s18 }
  0x2b   : > { %s127_s27 = sshll.u32 %s126_s26, 4 }
  0x2c   : > { %128 = vsyncadd %s727_s28, %s127_s27  ;;  %p730_p4 = scmp.ne.s32.totalorder %s328_s18, 0  ;;  %s341_s30 = sshll.u32 %s673_s22, 3 }
  0x2d   : > { %s133_s19 = scalar_lea.hbm %s834_s0, %s341_s30  ;;  %s332_s15 = sshll.u32 %s868_s23, 5 }
  0x2e   : > { %s136_s26 = sshll.u32 %s133_s19, 4  ;;  %s138_s9 = sshll.u32 %s118_s29, 4  ;;  %s137_s26 = int_to_ptr.hbm [resolvable:$true] %s136_s26  ;;  %s139_s9 = int_to_ptr.vmem [resolvable:$true] %s138_s9 }
  0x2f   : > { %s439_s21 = sshra.s32 %s137_s26, 4  ;;  %s441_s27 = sshrl.u32 %s332_s15, 4  ;;  %s440_s21 = int_to_ptr.hbm [resolvable:$true] %s439_s21 }
  0x30   : > { %s446_s14 = scalar_lea.hbm %s440_s21, %s441_s27  ;;  %s450_s3 = scalar_lea.hbm %s834_s0, 26 }
  0x31   : > { %p447_p5 = scmp.ne.s32.totalorder %s440_s21, %s446_s14  ;;  %p452_p9 = scmp.lt.s32.totalorder %s450_s3, %s446_s14 }
  0x33   : > { %p448_p6 = pnand %p447_p5, %p730_p4 }
  0x35   : > { %p449_p8 = pneg %p448_p6 }
  0x37   : > { %p454_p10 = pnand %p452_p9, %p449_p8 }
  0x39   : > { %457 = shalt.err (!%p454_p10)
}
  0x3a   : > { %s458_s19 = sshra.s32 %s139_s9, 4  ;;  %s602_s29 = smov [#allocation2]   ;;  %s459_s19 = int_to_ptr.vmem [resolvable:$true] %s458_s19 }
  0x3b   : > { %s465_s20 = scalar_lea.vmem %s459_s19, %s441_s27  ;;  %s469_s30 = scalar_lea.vmem %s602_s29, 16 }
  0x3c   : > { %p466_p11 = scmp.ne.s32.totalorder %s459_s19, %s465_s20  ;;  %p471_p2 = scmp.lt.s32.totalorder %s469_s30, %s465_s20 }
  0x3e   : > { %p467_p13 = pnand %p466_p11, %p730_p4 }
  0x40   : > { %p468_p0 = pneg %p467_p13 }
  0x42   : > { %p473_p3 = pnand %p471_p2, %p468_p0 }
  0x44   : > { %476 = shalt.err (!%p473_p3)
}
  0x45   : > { %141 = dma.hbm_to_vmem [thread:$0]  (%p730_p4), %s137_s26, %s332_s15, %s139_s9, %s727_s28  }
  0x46 PF: > { %p333_p5 = scmp.ge.s32.totalorder %s600_s16, 1  ;;  %p143_p6 = scmp.lt.s32.totalorder %s600_s16, 5 }
  0x48   : > { %p144_p8 = pnand %p333_p5, %p143_p6 }
  0x49   : > { %s149_s14 = sand.u32 (!%p144_p8), 1, %s576_s10  }
  0x4a   : > { %147 = sbr.rel (%p144_p8) target bundleno = 138 (0x8a), region = 24  ;;  %s334_s3 = sshll.u32 (!%p144_p8), %s149_s14, 3 }
  0x4b   : > { %s150_s17 = scalar_lea.sflag (!%p144_p8), [#allocation3], %s149_s14  ;;  %s756_s21 = scalar_lea.vmem (!%p144_p8), [#allocation2], %s334_s3 }
  0x4f   : > { %551 = dma.done.wait (%p689_p7), %s150_s17, 128  }
  0x50   : > { %553 = vsyncadd (%p689_p7), %s150_s17, 4294967168  ;;  %s170_s15 = sand.u32 1, %s564_s7   ;;  %p336_p4 = scmp.ne.s32.totalorder %s584_s12, 0 }
  0x51   : > { %s335_s23 = sshll.u32 %s170_s15, 1 }
  0x52   : > { %s765_s28 = scalar_lea.vmem [#allocation5], %s335_s23  ;;  %183 = sbr.rel (%p336_p4) target bundleno = 89 (0x59), region = 32 }
  0x57   : > { %v603_v0 = vmov 0.0  }
  0x58   : > { %184 = vst [vmem:[%s765_s28] sm:$0x3] %v603_v0 }
  0x59 PF: > { %p185_p9 = scmp.eq.s32.totalorder %s588_s13, 1  ;;  %p186_p10 = scmp.eq.s32.totalorder %s584_s12, 1 }
  0x5b   : > { %p187_p11 = pnand %p186_p10, %p185_p9 }
  0x5d   : > { %190 = sbr.rel (%p187_p11) target bundleno = 107 (0x6b), region = 36 }
  0x62   : > { %v193_v1 = vlaneseq  ;;  %v192_v2 = vld [vmem:[%s756_s21] sm:$0x3]  ;;  %v191_v4 = vld [vmem:[%s765_s28] sm:$0x3] }
  0x64   : > { %v194_v3 = vand.u32 127, %v193_v1 }
  0x66   : > { %vm195_vm0 = vcmp.lt.s32.totalorder %v194_v3, 64 }
  0x67   : > { %v196_v5 = vsel %vm195_vm0, %v192_v2, 0.0 }
  0x68   : > { %v197_v6 = vadd.f32 %v196_v5, %v191_v4 }
  0x6a   : > { %198 = vst [vmem:[%s765_s28] sm:$0x3] %v197_v6 }
  0x6b PF: > { %201 = sbr.rel (!%p187_p11) target bundleno = 123 (0x7b), region = 40  ;;  %v203_v8 = vld [vmem:[%s756_s21] sm:$0x3] (%p187_p11)  ;;  %v205_v9 = vld [vmem:[%s756_s21 + $0x2] sm:$0x3] (%p187_p11) }
  0x6c   : > { %v207_v11 = vld [vmem:[%s756_s21 + $0x4] sm:$0x3] (%p187_p11)  ;;  %v209_v13 = vld [vmem:[%s756_s21 + $0x6] sm:$0x3] (%p187_p11) }
  0x71   : > { %v202_v7 = vld [vmem:[%s765_s28] sm:$0x3] }
  0x72   : > { %v204_v10 = vadd.f32 %v203_v8, %v202_v7 }
  0x74   : > { %v206_v12 = vadd.f32 %v205_v9, %v204_v10 }
  0x76   : > { %v208_v14 = vadd.f32 %v207_v11, %v206_v12 }
  0x78   : > { %v210_v15 = vadd.f32 %v209_v13, %v208_v14 }
  0x7a   : > { %211 = vst [vmem:[%s765_s28] sm:$0x3] %v210_v15 }
  0x7b PF: > { %s338_s12 = sshll.u32 %s588_s13, 1  ;;  %s226_s9 = sshll.u32 %s765_s28, 4  ;;  %s227_s9 = int_to_ptr.vmem [resolvable:$true] %s226_s9 }
  0x7c   : > { %s224_s26 = scalar_lea.hbm %s835_s1, %s338_s12  ;;  %s213_s18 = scalar_lea.sflag [#allocation4], %s170_s15 }
  0x7d   : > { %s228_s27 = sshll.u32 %s224_s26, 4  ;;  %s498_s13 = scalar_lea.hbm %s835_s1, 4  ;;  %s229_s27 = int_to_ptr.hbm [resolvable:$true] %s228_s27 }
  0x7e   : > { %s492_s22 = sshra.s32 %s229_s27, 4  ;;  %s493_s22 = int_to_ptr.hbm [resolvable:$true] %s492_s22 }
  0x7f   : > { %s494_s19 = scalar_lea.hbm %s493_s22, 2  ;;  %p499_p2 = scmp.lt.s32.totalorder %s493_s22, %s835_s1 }
  0x80   : > { %p495_p7 = scmp.ne.s32.totalorder %s493_s22, %s494_s19  ;;  %p500_p3 = scmp.lt.s32.totalorder %s498_s13, %s494_s19 }
  0x82   : > { %p496_p13 = pnand %p495_p7, %p707_p12  ;;  %p501_p5 = por %p500_p3, %p499_p2 }
  0x84   : > { %p497_p0 = pneg %p496_p13 }
  0x86   : > { %p502_p6 = pnand %p501_p5, %p497_p0 }
  0x88   : > { %505 = shalt.err (!%p502_p6)
}
  0x89   : > { %343 = dma.vmem_to_hbm [thread:$0]  (%p707_p12), %s227_s9, 32, %s229_s27, %s213_s18  }
  0x8a PF: > { %p349_p8 = scmp.ge.s32.totalorder %s600_s16, 2  ;;  %s240_s3 = sand.u32 1, %s560_s6  }
  0x8b   : > { %s241_s17 = scalar_lea.sflag [#allocation4], %s240_s3 }
  0x8c   : > { %p346_p4 = pnand %p349_p8, %p715_p1 }
  0x8e   : > { %p347_p9 = pneg %p346_p4 }
  0x90   : > { %555 = dma.done.wait (%p347_p9), %s241_s17, 32  }
  0x91   : > { %557 = vsyncadd (%p347_p9), %s241_s17, 4294967264  ;;  %s17_s16 = sadd.s32 1, %s600_s16   ;;  %s850_s4 = sld [smem:[#allocation12_spill]] }
  0x92   : > { %p14_p10 = scmp.ge.s32.totalorder %s17_s16, 6   ;;  %s851_s12 = sld [smem:[#allocation8_spill]] }
  0x93   : > { %s852_s13 = sld [smem:[#allocation9_spill]]  ;;  %s855_s6 = smov %s564_s7 }
  0x94   : > { %s853_s14 = sld [smem:[#allocation10_spill]]  ;;  %s856_s7 = smov %s568_s8 }
  0x95   : > { %s854_s15 = sld [smem:[#allocation11_spill]]  ;;  %s857_s8 = smov %s702_s2 }
  0x96   : > { %s858_s9 = smov %s576_s10  ;;  %s859_s10 = smov %s580_s11 }
  0x97   : > { %s860_s11 = smov %s850_s4  ;;  %16 = sbr.rel (!%p14_p10) target bundleno = 9 (0x9), region = 81 }
  0x9c   :  { %247 = vsyncpa [#allocation3], 1 }
  0x9d   :  { %249 = vsyncpa [#allocation3 + $0x1], 1 }
  0x9e   :  { %250 = vsyncpa [#allocation4], 1 }
  0x9f   :  { %252 = vsyncpa [#allocation4 + $0x1], 1 }

</bundles_post_ra>
